<compile_context>
chip_gen: v7x
topology: tpu7x:2x2x1
jax: 0.10.0
libtpu: 0.0.40
codegen_flags: <defaults>
</compile_context>

<pallas_src>
import math

import jax
import jax.numpy as jnp
from jax.experimental import pallas as pl
from jax.experimental.pallas import tpu as pltpu

_LN_EPS = 1e-5
_VMEM_LIMIT_BYTES = 48 * 1024 * 1024  # above all default scoped limits, safe on v5e/v6e/v7x


# ---------------------------------------------------------------------------
# In-kernel helpers (operate on f32 values, shared between kernels)
# ---------------------------------------------------------------------------

def _layernorm(x, gamma, beta, eps=_LN_EPS):
    mu = jnp.mean(x, axis=-1, keepdims=True)
    xc = x - mu
    var = jnp.mean(xc * xc, axis=-1, keepdims=True)
    return xc * jax.lax.rsqrt(var + eps) * gamma + beta


def _mha(q_all, k_all, v_all, wo, bo, n_heads, d_head):
    """Multi-head attention on head-packed (rows, H*E) f32 activations.

    The 1/sqrt(E) scale is already folded into the Q projection (init time).
    Per head: bf16 MXU matmuls with f32 accumulation, exact f32 softmax.
    Instead of concatenating head contexts (lane relayout + masked stores),
    the output projection is accumulated per head against the matching
    sublane slice of Wo:  attn_out = sum_h ctx_h @ Wo[h*E:(h+1)*E, :].
    """
    attn = None
    for h in range(n_heads):
        sl = slice(h * d_head, (h + 1) * d_head)
        q = q_all[:, sl].astype(jnp.bfloat16)                         # (L, E)
        k = k_all[:, sl].astype(jnp.bfloat16)                         # (S, E)
        v = v_all[:, sl].astype(jnp.bfloat16)                         # (S, E)
        s = jax.lax.dot_general(q, k, (((1,), (1,)), ((), ())),
                                preferred_element_type=jnp.float32)   # (L, S) f32
        s = s - jnp.max(s, axis=-1, keepdims=True)
        p = jnp.exp(s)
        p = p / jnp.sum(p, axis=-1, keepdims=True)                    # exact softmax (f32)
        ctx = jnp.dot(p.astype(jnp.bfloat16), v,
                      preferred_element_type=jnp.float32)             # (L, E) f32
        contrib = jnp.dot(ctx.astype(jnp.bfloat16), wo[sl, :],
                          preferred_element_type=jnp.float32)         # (L, D) f32
        attn = contrib if attn is None else attn + contrib
    return attn + bo


# ---------------------------------------------------------------------------
# Pallas kernels
# ---------------------------------------------------------------------------

def _make_self_block_kernel(n_heads, d_head):
    he = n_heads * d_head

    def kernel(x_ref, wqkv_ref, bqkv_ref, wo_ref, bo_ref, g_ref, b_ref, o_ref):
        x = x_ref[0]                                                  # (L, D) f32
        qkv = jnp.dot(x.astype(jnp.bfloat16), wqkv_ref[...],
                      preferred_element_type=jnp.float32) + bqkv_ref[...]
        attn = _mha(qkv[:, :he], qkv[:, he:2 * he], qkv[:, 2 * he:],
                    wo_ref[...], bo_ref[...], n_heads, d_head)
        o_ref[0] = _layernorm(x + attn, g_ref[...], b_ref[...])       # norm1

    return kernel


def _make_cross_ffn_kernel(n_heads, d_head, activation):
    he = n_heads * d_head

    def kernel(x_ref, cross_ref, wq_ref, bq_ref, wkv_ref, bkv_ref,
               wo_ref, bo_ref, g2_ref, b2_ref,
               w1_ref, fb1_ref, w2_ref, fb2_ref, g3_ref, b3_ref, o_ref):
        x = x_ref[0]                                                  # (tl, D) f32
        cr = cross_ref[0]                                             # (S, D) f32

        # ---- cross attention + residual + norm2 ----
        q_all = jnp.dot(x.astype(jnp.bfloat16), wq_ref[...],
                        preferred_element_type=jnp.float32) + bq_ref[...]
        kv = jnp.dot(cr.astype(jnp.bfloat16), wkv_ref[...],
                     preferred_element_type=jnp.float32) + bkv_ref[...]
        attn = _mha(q_all, kv[:, :he], kv[:, he:],
                    wo_ref[...], bo_ref[...], n_heads, d_head)
        x2 = _layernorm(x + attn, g2_ref[...], b2_ref[...])           # norm2, f32

        # ---- FFN (Conv1d k=1 == pointwise linear) + residual + norm3 ----
        h = jnp.dot(x2.astype(jnp.bfloat16), w1_ref[...],
                    preferred_element_type=jnp.float32) + fb1_ref[...]
        if activation == "relu":
            h = jnp.maximum(h, 0.0)
        else:
            h = jax.nn.gelu(h, approximate=False)
        y = jnp.dot(h.astype(jnp.bfloat16), w2_ref[...],
                    preferred_element_type=jnp.float32) + fb2_ref[...]
        o_ref[0] = _layernorm(x2 + y, g3_ref[...], b3_ref[...])       # norm3

    return kernel


# ---------------------------------------------------------------------------
# pallas_call wrappers
# ---------------------------------------------------------------------------

def _self_attn_block(x, p, n_heads):
    B, L, D = x.shape
    he = p["wo_self"].shape[0]
    d_head = he // n_heads
    const = lambda b: (0, 0)
    return pl.pallas_call(
        _make_self_block_kernel(n_heads, d_head),
        out_shape=jax.ShapeDtypeStruct((B, L, D), jnp.float32),
        grid=(B,),
        in_specs=[
            pl.BlockSpec((1, L, D), lambda b: (b, 0, 0)),
            pl.BlockSpec((D, 3 * he), const),
            pl.BlockSpec((1, 3 * he), const),
            pl.BlockSpec((he, D), const),
            pl.BlockSpec((1, D), const),
            pl.BlockSpec((1, D), const),
            pl.BlockSpec((1, D), const),
        ],
        out_specs=pl.BlockSpec((1, L, D), lambda b: (b, 0, 0)),
        compiler_params=pltpu.CompilerParams(
            dimension_semantics=("parallel",),
            vmem_limit_bytes=_VMEM_LIMIT_BYTES),
    )(x, p["wqkv_self"], p["bqkv_self"], p["wo_self"], p["bo_self"],
      p["ln1_g"], p["ln1_b"])


def _pick_seq_tile(n):
    # Largest (8,128)-friendly tile dividing the query length; fall back to
    # the full (already block-shape-legal) extent for small/odd L.
    for c in (256, 128):
        if n % c == 0:
            return c
    return n


def _cross_ffn_block(x, cross, p, n_heads, activation):
    B, L, D = x.shape
    S = cross.shape[1]
    he = p["wo_cross"].shape[0]
    d_head = he // n_heads
    dff = p["w1"].shape[1]
    tl = _pick_seq_tile(L)
    row = lambda b, i: (b, i, 0)
    full = lambda b, i: (b, 0, 0)
    const = lambda b, i: (0, 0)
    return pl.pallas_call(
        _make_cross_ffn_kernel(n_heads, d_head, activation),
        out_shape=jax.ShapeDtypeStruct((B, L, D), jnp.float32),
        grid=(B, L // tl),
        in_specs=[
            pl.BlockSpec((1, tl, D), row),     # x1 query/residual rows
            pl.BlockSpec((1, S, D), full),     # cross (K/V source, full S)
            pl.BlockSpec((D, he), const),
            pl.BlockSpec((1, he), const),
            pl.BlockSpec((D, 2 * he), const),
            pl.BlockSpec((1, 2 * he), const),
            pl.BlockSpec((he, D), const),
            pl.BlockSpec((1, D), const),
            pl.BlockSpec((1, D), const),
            pl.BlockSpec((1, D), const),
            pl.BlockSpec((D, dff), const),
            pl.BlockSpec((1, dff), const),
            pl.BlockSpec((dff, D), const),
            pl.BlockSpec((1, D), const),
            pl.BlockSpec((1, D), const),
            pl.BlockSpec((1, D), const),
        ],
        out_specs=pl.BlockSpec((1, tl, D), row),
        compiler_params=pltpu.CompilerParams(
            dimension_semantics=("parallel", "parallel"),
            vmem_limit_bytes=_VMEM_LIMIT_BYTES),
    )(x, cross, p["wq_cross"], p["bq_cross"], p["wkv_cross"], p["bkv_cross"],
      p["wo_cross"], p["bo_cross"], p["ln2_g"], p["ln2_b"],
      p["w1"], p["b1"], p["w2"], p["b2"], p["ln3_g"], p["ln3_b"])


# ---------------------------------------------------------------------------
# DecoderLayer forward
# ---------------------------------------------------------------------------

def decoder_layer_forward(params, x, cross, x_mask=None, cross_mask=None,
                          n_heads=4, activation="relu"):
    """x: (B, L, d_model), cross: (B, S, d_model) -> (B, L, d_model)."""
    x1 = _self_attn_block(x, params, n_heads)                  # norm1(x + SelfAttn(x))
    return _cross_ffn_block(x1, cross, params, n_heads,        # norm3(norm2(...) + FFN(...))
                            activation)


# ---------------------------------------------------------------------------
# Deterministic parameter init (mirrors nn.Linear / Conv1d(k=1) / LayerNorm)
# ---------------------------------------------------------------------------

def init_params(key, d_model, n_heads, d_ff=None):
    d_ff = d_ff or 4 * d_model
    d_head = d_model // n_heads          # d_keys == d_values (default config)
    he = n_heads * d_head
    scale = 1.0 / math.sqrt(d_head)
    ks = jax.random.split(key, 20)

    def lin(kw, kb, din, dout):
        bound = 1.0 / math.sqrt(din)
        w = jax.random.uniform(kw, (din, dout), jnp.float32, -bound, bound)
        b = jax.random.uniform(kb, (1, dout), jnp.float32, -bound, bound)
        return w, b

    # Self-attention projections (fused QKV: one wide matmul, lane-dense output).
    wq_s, bq_s = lin(ks[0], ks[1], d_model, he)
    wk_s, bk_s = lin(ks[2], ks[3], d_model, he)
    wv_s, bv_s = lin(ks[4], ks[5], d_model, he)
    wo_s, bo_s = lin(ks[6], ks[7], he, d_model)
    # Cross-attention projections (Q alone; fused KV from `cross`).
    wq_c, bq_c = lin(ks[8], ks[9], d_model, he)
    wk_c, bk_c = lin(ks[10], ks[11], d_model, he)
    wv_c, bv_c = lin(ks[12], ks[13], d_model, he)
    wo_c, bo_c = lin(ks[14], ks[15], he, d_model)
    # FFN: Conv1d(kernel_size=1) == pointwise linear over channels.
    w1, b1 = lin(ks[16], ks[17], d_model, d_ff)
    w2, b2 = lin(ks[18], ks[19], d_ff, d_model)

    # Fold the 1/sqrt(d_head) attention scale into the Q projections
    # (weights AND biases): softmax((xWq+bq)K^T * s) == softmax((x(sWq)+(s bq))K^T).
    wq_s, bq_s = wq_s * scale, bq_s * scale
    wq_c, bq_c = wq_c * scale, bq_c * scale

    bf16 = lambda a: a.astype(jnp.bfloat16)    # matmul weights live in bf16
    ones = jnp.ones((1, d_model), jnp.float32)
    zeros = jnp.zeros((1, d_model), jnp.float32)
    return dict(
        wqkv_self=bf16(jnp.concatenate([wq_s, wk_s, wv_s], axis=1)),
        bqkv_self=jnp.concatenate([bq_s, bk_s, bv_s], axis=1),
        wo_self=bf16(wo_s), bo_self=bo_s,
        wq_cross=bf16(wq_c), bq_cross=bq_c,
        wkv_cross=bf16(jnp.concatenate([wk_c, wv_c], axis=1)),
        bkv_cross=jnp.concatenate([bk_c, bv_c], axis=1),
        wo_cross=bf16(wo_c), bo_cross=bo_c,
        w1=bf16(w1), b1=b1, w2=bf16(w2), b2=b2,
        ln1_g=ones, ln1_b=zeros,
        ln2_g=ones, ln2_b=zeros,
        ln3_g=ones, ln3_b=zeros,
    )


if __name__ == "__main__":
    B, L, S = 2, 8, 16
    d_model, n_heads = 32, 4

    root = jax.random.PRNGKey(0)
    kp, kx, kc = jax.random.split(root, 3)
    params = init_params(kp, d_model, n_heads)

    x = jax.random.normal(kx, (B, L, d_model), jnp.float32)
    cross = jax.random.normal(kc, (B, S, d_model), jnp.float32)

    out = decoder_layer_forward(params, x, cross, x_mask=None, cross_mask=None,
                                n_heads=n_heads, activation="relu")
    out = jax.block_until_ready(out)
    assert out.shape == (B, L, d_model)
    assert bool(jnp.all(jnp.isfinite(out)))
    print("KERNEL_OK")
</pallas_src>

<mosaic_0001>
module attributes {stable_mosaic.version = 11 : i64} {
  func.func @kernel(%arg0: i32, %arg1: memref<1x8x32xf32, #tpu.memory_space<vmem>>, %arg2: memref<32x96xbf16, #tpu.memory_space<vmem>>, %arg3: memref<1x96xf32, #tpu.memory_space<vmem>>, %arg4: memref<32x32xbf16, #tpu.memory_space<vmem>>, %arg5: memref<1x32xf32, #tpu.memory_space<vmem>>, %arg6: memref<1x32xf32, #tpu.memory_space<vmem>>, %arg7: memref<1x32xf32, #tpu.memory_space<vmem>>, %arg8: memref<1x8x32xf32, #tpu.memory_space<vmem>>) attributes {dimension_semantics = [#tpu.dimension_semantics<parallel>], iteration_bounds = array<i64: 2>, scalar_prefetch = 0 : i64, scratch_operands = 0 : i64, tpu.core_type = #tpu.core_type<tc>, window_params = [{transform_indices = @transform_0, window_bounds = array<i64: 1, 8, 32>}, {pipeline_mode = #tpu.pipeline_mode<synchronous>, transform_indices = @transform_1, window_bounds = array<i64: 32, 96>}, {pipeline_mode = #tpu.pipeline_mode<synchronous>, transform_indices = @transform_2, window_bounds = array<i64: 1, 96>}, {pipeline_mode = #tpu.pipeline_mode<synchronous>, transform_indices = @transform_3, window_bounds = array<i64: 32, 32>}, {pipeline_mode = #tpu.pipeline_mode<synchronous>, transform_indices = @transform_4, window_bounds = array<i64: 1, 32>}, {pipeline_mode = #tpu.pipeline_mode<synchronous>, transform_indices = @transform_5, window_bounds = array<i64: 1, 32>}, {pipeline_mode = #tpu.pipeline_mode<synchronous>, transform_indices = @transform_6, window_bounds = array<i64: 1, 32>}, {transform_indices = @transform_7, window_bounds = array<i64: 1, 8, 32>}]} {
    %c0 = arith.constant 0 : index
    %c0_0 = arith.constant 0 : index
    %c0_1 = arith.constant 0 : index
    %0 = vector.load %arg1[%c0, %c0_0, %c0_1] : memref<1x8x32xf32, #tpu.memory_space<vmem>>, vector<1x8x32xf32>
    %1 = vector.shape_cast %0 : vector<1x8x32xf32> to vector<8x32xf32>
    %2 = arith.truncf %1 : vector<8x32xf32> to vector<8x32xbf16>
    %c0_2 = arith.constant 0 : index
    %c0_3 = arith.constant 0 : index
    %3 = vector.load %arg2[%c0_2, %c0_3] : memref<32x96xbf16, #tpu.memory_space<vmem>>, vector<32x96xbf16>
    %cst = arith.constant dense<0.000000e+00> : vector<8x96xf32>
    %4 = tpu.matmul %2, %3, %cst {dimension_numbers = #tpu.dot_dimension_numbers<[1], [0], [0], [1], [0, 0, 1, 1], [], []>} : vector<8x32xbf16>, vector<32x96xbf16>, vector<8x96xf32> -> vector<8x96xf32>
    %c0_4 = arith.constant 0 : index
    %c0_5 = arith.constant 0 : index
    %5 = vector.load %arg3[%c0_4, %c0_5] : memref<1x96xf32, #tpu.memory_space<vmem>>, vector<1x96xf32>
    %6 = vector.broadcast %5 : vector<1x96xf32> to vector<8x96xf32>
    %7 = arith.addf %4, %6 : vector<8x96xf32>
    %8 = vector.extract_strided_slice %7 {offsets = [0, 0], sizes = [8, 32], strides = [1, 1]} : vector<8x96xf32> to vector<8x32xf32>
    %9 = vector.extract_strided_slice %7 {offsets = [0, 32], sizes = [8, 32], strides = [1, 1]} : vector<8x96xf32> to vector<8x32xf32>
    %10 = vector.extract_strided_slice %7 {offsets = [0, 64], sizes = [8, 32], strides = [1, 1]} : vector<8x96xf32> to vector<8x32xf32>
    %c0_6 = arith.constant 0 : index
    %c0_7 = arith.constant 0 : index
    %11 = vector.load %arg4[%c0_6, %c0_7] : memref<32x32xbf16, #tpu.memory_space<vmem>>, vector<32x32xbf16>
    %c0_8 = arith.constant 0 : index
    %c0_9 = arith.constant 0 : index
    %12 = vector.load %arg5[%c0_8, %c0_9] : memref<1x32xf32, #tpu.memory_space<vmem>>, vector<1x32xf32>
    %13 = vector.extract_strided_slice %8 {offsets = [0, 0], sizes = [8, 8], strides = [1, 1]} : vector<8x32xf32> to vector<8x8xf32>
    %14 = arith.truncf %13 : vector<8x8xf32> to vector<8x8xbf16>
    %15 = vector.extract_strided_slice %9 {offsets = [0, 0], sizes = [8, 8], strides = [1, 1]} : vector<8x32xf32> to vector<8x8xf32>
    %16 = arith.truncf %15 : vector<8x8xf32> to vector<8x8xbf16>
    %17 = vector.extract_strided_slice %10 {offsets = [0, 0], sizes = [8, 8], strides = [1, 1]} : vector<8x32xf32> to vector<8x8xf32>
    %18 = arith.truncf %17 : vector<8x8xf32> to vector<8x8xbf16>
    %cst_10 = arith.constant dense<0.000000e+00> : vector<8x8xf32>
    %19 = tpu.matmul %14, %16, %cst_10 {dimension_numbers = #tpu.dot_dimension_numbers<[1], [1], [0], [0], [0, 0, 1, 0], [], []>} : vector<8x8xbf16>, vector<8x8xbf16>, vector<8x8xf32> -> vector<8x8xf32>
    %cst_11 = arith.constant dense<0xFF800000> : vector<8xf32>
    %20 = vector.multi_reduction <maximumf>, %19, %cst_11 [1] : vector<8x8xf32> to vector<8xf32>
    %21 = vector.shape_cast %20 : vector<8xf32> to vector<8x1xf32>
    %22 = vector.broadcast %21 : vector<8x1xf32> to vector<8x8xf32>
    %23 = arith.subf %19, %22 : vector<8x8xf32>
    %24 = math.exp %23 : vector<8x8xf32>
    %cst_12 = arith.constant dense<0.000000e+00> : vector<8xf32>
    %25 = vector.multi_reduction <add>, %24, %cst_12 [1] : vector<8x8xf32> to vector<8xf32>
    %26 = vector.shape_cast %25 : vector<8xf32> to vector<8x1xf32>
    %27 = vector.broadcast %26 : vector<8x1xf32> to vector<8x8xf32>
    %28 = arith.divf %24, %27 : vector<8x8xf32>
    %29 = arith.truncf %28 : vector<8x8xf32> to vector<8x8xbf16>
    %cst_13 = arith.constant dense<0.000000e+00> : vector<8x8xf32>
    %30 = tpu.matmul %29, %18, %cst_13 {dimension_numbers = #tpu.dot_dimension_numbers<[1], [0], [0], [1], [0, 0, 1, 1], [], []>} : vector<8x8xbf16>, vector<8x8xbf16>, vector<8x8xf32> -> vector<8x8xf32>
    %31 = arith.truncf %30 : vector<8x8xf32> to vector<8x8xbf16>
    %32 = vector.extract_strided_slice %11 {offsets = [0, 0], sizes = [8, 32], strides = [1, 1]} : vector<32x32xbf16> to vector<8x32xbf16>
    %cst_14 = arith.constant dense<0.000000e+00> : vector<8x32xf32>
    %33 = tpu.matmul %31, %32, %cst_14 {dimension_numbers = #tpu.dot_dimension_numbers<[1], [0], [0], [1], [0, 0, 1, 1], [], []>} : vector<8x8xbf16>, vector<8x32xbf16>, vector<8x32xf32> -> vector<8x32xf32>
    %34 = vector.extract_strided_slice %8 {offsets = [0, 8], sizes = [8, 8], strides = [1, 1]} : vector<8x32xf32> to vector<8x8xf32>
    %35 = arith.truncf %34 : vector<8x8xf32> to vector<8x8xbf16>
    %36 = vector.extract_strided_slice %9 {offsets = [0, 8], sizes = [8, 8], strides = [1, 1]} : vector<8x32xf32> to vector<8x8xf32>
    %37 = arith.truncf %36 : vector<8x8xf32> to vector<8x8xbf16>
    %38 = vector.extract_strided_slice %10 {offsets = [0, 8], sizes = [8, 8], strides = [1, 1]} : vector<8x32xf32> to vector<8x8xf32>
    %39 = arith.truncf %38 : vector<8x8xf32> to vector<8x8xbf16>
    %cst_15 = arith.constant dense<0.000000e+00> : vector<8x8xf32>
    %40 = tpu.matmul %35, %37, %cst_15 {dimension_numbers = #tpu.dot_dimension_numbers<[1], [1], [0], [0], [0, 0, 1, 0], [], []>} : vector<8x8xbf16>, vector<8x8xbf16>, vector<8x8xf32> -> vector<8x8xf32>
    %cst_16 = arith.constant dense<0xFF800000> : vector<8xf32>
    %41 = vector.multi_reduction <maximumf>, %40, %cst_16 [1] : vector<8x8xf32> to vector<8xf32>
    %42 = vector.shape_cast %41 : vector<8xf32> to vector<8x1xf32>
    %43 = vector.broadcast %42 : vector<8x1xf32> to vector<8x8xf32>
    %44 = arith.subf %40, %43 : vector<8x8xf32>
    %45 = math.exp %44 : vector<8x8xf32>
    %cst_17 = arith.constant dense<0.000000e+00> : vector<8xf32>
    %46 = vector.multi_reduction <add>, %45, %cst_17 [1] : vector<8x8xf32> to vector<8xf32>
    %47 = vector.shape_cast %46 : vector<8xf32> to vector<8x1xf32>
    %48 = vector.broadcast %47 : vector<8x1xf32> to vector<8x8xf32>
    %49 = arith.divf %45, %48 : vector<8x8xf32>
    %50 = arith.truncf %49 : vector<8x8xf32> to vector<8x8xbf16>
    %cst_18 = arith.constant dense<0.000000e+00> : vector<8x8xf32>
    %51 = tpu.matmul %50, %39, %cst_18 {dimension_numbers = #tpu.dot_dimension_numbers<[1], [0], [0], [1], [0, 0, 1, 1], [], []>} : vector<8x8xbf16>, vector<8x8xbf16>, vector<8x8xf32> -> vector<8x8xf32>
    %52 = arith.truncf %51 : vector<8x8xf32> to vector<8x8xbf16>
    %53 = vector.extract_strided_slice %11 {offsets = [8, 0], sizes = [8, 32], strides = [1, 1]} : vector<32x32xbf16> to vector<8x32xbf16>
    %cst_19 = arith.constant dense<0.000000e+00> : vector<8x32xf32>
    %54 = tpu.matmul %52, %53, %cst_19 {dimension_numbers = #tpu.dot_dimension_numbers<[1], [0], [0], [1], [0, 0, 1, 1], [], []>} : vector<8x8xbf16>, vector<8x32xbf16>, vector<8x32xf32> -> vector<8x32xf32>
    %55 = arith.addf %33, %54 : vector<8x32xf32>
    %56 = vector.extract_strided_slice %8 {offsets = [0, 16], sizes = [8, 8], strides = [1, 1]} : vector<8x32xf32> to vector<8x8xf32>
    %57 = arith.truncf %56 : vector<8x8xf32> to vector<8x8xbf16>
    %58 = vector.extract_strided_slice %9 {offsets = [0, 16], sizes = [8, 8], strides = [1, 1]} : vector<8x32xf32> to vector<8x8xf32>
    %59 = arith.truncf %58 : vector<8x8xf32> to vector<8x8xbf16>
    %60 = vector.extract_strided_slice %10 {offsets = [0, 16], sizes = [8, 8], strides = [1, 1]} : vector<8x32xf32> to vector<8x8xf32>
    %61 = arith.truncf %60 : vector<8x8xf32> to vector<8x8xbf16>
    %cst_20 = arith.constant dense<0.000000e+00> : vector<8x8xf32>
    %62 = tpu.matmul %57, %59, %cst_20 {dimension_numbers = #tpu.dot_dimension_numbers<[1], [1], [0], [0], [0, 0, 1, 0], [], []>} : vector<8x8xbf16>, vector<8x8xbf16>, vector<8x8xf32> -> vector<8x8xf32>
    %cst_21 = arith.constant dense<0xFF800000> : vector<8xf32>
    %63 = vector.multi_reduction <maximumf>, %62, %cst_21 [1] : vector<8x8xf32> to vector<8xf32>
    %64 = vector.shape_cast %63 : vector<8xf32> to vector<8x1xf32>
    %65 = vector.broadcast %64 : vector<8x1xf32> to vector<8x8xf32>
    %66 = arith.subf %62, %65 : vector<8x8xf32>
    %67 = math.exp %66 : vector<8x8xf32>
    %cst_22 = arith.constant dense<0.000000e+00> : vector<8xf32>
    %68 = vector.multi_reduction <add>, %67, %cst_22 [1] : vector<8x8xf32> to vector<8xf32>
    %69 = vector.shape_cast %68 : vector<8xf32> to vector<8x1xf32>
    %70 = vector.broadcast %69 : vector<8x1xf32> to vector<8x8xf32>
    %71 = arith.divf %67, %70 : vector<8x8xf32>
    %72 = arith.truncf %71 : vector<8x8xf32> to vector<8x8xbf16>
    %cst_23 = arith.constant dense<0.000000e+00> : vector<8x8xf32>
    %73 = tpu.matmul %72, %61, %cst_23 {dimension_numbers = #tpu.dot_dimension_numbers<[1], [0], [0], [1], [0, 0, 1, 1], [], []>} : vector<8x8xbf16>, vector<8x8xbf16>, vector<8x8xf32> -> vector<8x8xf32>
    %74 = arith.truncf %73 : vector<8x8xf32> to vector<8x8xbf16>
    %75 = vector.extract_strided_slice %11 {offsets = [16, 0], sizes = [8, 32], strides = [1, 1]} : vector<32x32xbf16> to vector<8x32xbf16>
    %cst_24 = arith.constant dense<0.000000e+00> : vector<8x32xf32>
    %76 = tpu.matmul %74, %75, %cst_24 {dimension_numbers = #tpu.dot_dimension_numbers<[1], [0], [0], [1], [0, 0, 1, 1], [], []>} : vector<8x8xbf16>, vector<8x32xbf16>, vector<8x32xf32> -> vector<8x32xf32>
    %77 = arith.addf %55, %76 : vector<8x32xf32>
    %78 = vector.extract_strided_slice %8 {offsets = [0, 24], sizes = [8, 8], strides = [1, 1]} : vector<8x32xf32> to vector<8x8xf32>
    %79 = arith.truncf %78 : vector<8x8xf32> to vector<8x8xbf16>
    %80 = vector.extract_strided_slice %9 {offsets = [0, 24], sizes = [8, 8], strides = [1, 1]} : vector<8x32xf32> to vector<8x8xf32>
    %81 = arith.truncf %80 : vector<8x8xf32> to vector<8x8xbf16>
    %82 = vector.extract_strided_slice %10 {offsets = [0, 24], sizes = [8, 8], strides = [1, 1]} : vector<8x32xf32> to vector<8x8xf32>
    %83 = arith.truncf %82 : vector<8x8xf32> to vector<8x8xbf16>
    %cst_25 = arith.constant dense<0.000000e+00> : vector<8x8xf32>
    %84 = tpu.matmul %79, %81, %cst_25 {dimension_numbers = #tpu.dot_dimension_numbers<[1], [1], [0], [0], [0, 0, 1, 0], [], []>} : vector<8x8xbf16>, vector<8x8xbf16>, vector<8x8xf32> -> vector<8x8xf32>
    %cst_26 = arith.constant dense<0xFF800000> : vector<8xf32>
    %85 = vector.multi_reduction <maximumf>, %84, %cst_26 [1] : vector<8x8xf32> to vector<8xf32>
    %86 = vector.shape_cast %85 : vector<8xf32> to vector<8x1xf32>
    %87 = vector.broadcast %86 : vector<8x1xf32> to vector<8x8xf32>
    %88 = arith.subf %84, %87 : vector<8x8xf32>
    %89 = math.exp %88 : vector<8x8xf32>
    %cst_27 = arith.constant dense<0.000000e+00> : vector<8xf32>
    %90 = vector.multi_reduction <add>, %89, %cst_27 [1] : vector<8x8xf32> to vector<8xf32>
    %91 = vector.shape_cast %90 : vector<8xf32> to vector<8x1xf32>
    %92 = vector.broadcast %91 : vector<8x1xf32> to vector<8x8xf32>
    %93 = arith.divf %89, %92 : vector<8x8xf32>
    %94 = arith.truncf %93 : vector<8x8xf32> to vector<8x8xbf16>
    %cst_28 = arith.constant dense<0.000000e+00> : vector<8x8xf32>
    %95 = tpu.matmul %94, %83, %cst_28 {dimension_numbers = #tpu.dot_dimension_numbers<[1], [0], [0], [1], [0, 0, 1, 1], [], []>} : vector<8x8xbf16>, vector<8x8xbf16>, vector<8x8xf32> -> vector<8x8xf32>
    %96 = arith.truncf %95 : vector<8x8xf32> to vector<8x8xbf16>
    %97 = vector.extract_strided_slice %11 {offsets = [24, 0], sizes = [8, 32], strides = [1, 1]} : vector<32x32xbf16> to vector<8x32xbf16>
    %cst_29 = arith.constant dense<0.000000e+00> : vector<8x32xf32>
    %98 = tpu.matmul %96, %97, %cst_29 {dimension_numbers = #tpu.dot_dimension_numbers<[1], [0], [0], [1], [0, 0, 1, 1], [], []>} : vector<8x8xbf16>, vector<8x32xbf16>, vector<8x32xf32> -> vector<8x32xf32>
    %99 = arith.addf %77, %98 : vector<8x32xf32>
    %100 = vector.broadcast %12 : vector<1x32xf32> to vector<8x32xf32>
    %101 = arith.addf %99, %100 : vector<8x32xf32>
    %102 = arith.addf %1, %101 : vector<8x32xf32>
    %c0_30 = arith.constant 0 : index
    %c0_31 = arith.constant 0 : index
    %103 = vector.load %arg6[%c0_30, %c0_31] : memref<1x32xf32, #tpu.memory_space<vmem>>, vector<1x32xf32>
    %c0_32 = arith.constant 0 : index
    %c0_33 = arith.constant 0 : index
    %104 = vector.load %arg7[%c0_32, %c0_33] : memref<1x32xf32, #tpu.memory_space<vmem>>, vector<1x32xf32>
    %cst_34 = arith.constant dense<0.000000e+00> : vector<8xf32>
    %105 = vector.multi_reduction <add>, %102, %cst_34 [1] : vector<8x32xf32> to vector<8xf32>
    %106 = vector.shape_cast %105 : vector<8xf32> to vector<8x1xf32>
    %cst_35 = arith.constant 3.200000e+01 : f32
    %107 = vector.broadcast %cst_35 : f32 to vector<8x1xf32>
    %108 = arith.divf %106, %107 : vector<8x1xf32>
    %109 = vector.broadcast %108 : vector<8x1xf32> to vector<8x32xf32>
    %110 = arith.subf %102, %109 : vector<8x32xf32>
    %111 = arith.mulf %110, %110 : vector<8x32xf32>
    %cst_36 = arith.constant dense<0.000000e+00> : vector<8xf32>
    %112 = vector.multi_reduction <add>, %111, %cst_36 [1] : vector<8x32xf32> to vector<8xf32>
    %113 = vector.shape_cast %112 : vector<8xf32> to vector<8x1xf32>
    %cst_37 = arith.constant 3.200000e+01 : f32
    %114 = vector.broadcast %cst_37 : f32 to vector<8x1xf32>
    %115 = arith.divf %113, %114 : vector<8x1xf32>
    %cst_38 = arith.constant 9.99999974E-6 : f32
    %116 = vector.broadcast %cst_38 : f32 to vector<8x1xf32>
    %117 = arith.addf %115, %116 : vector<8x1xf32>
    %118 = math.rsqrt %117 : vector<8x1xf32>
    %119 = vector.broadcast %118 : vector<8x1xf32> to vector<8x32xf32>
    %120 = arith.mulf %110, %119 : vector<8x32xf32>
    %121 = vector.broadcast %103 : vector<1x32xf32> to vector<8x32xf32>
    %122 = arith.mulf %120, %121 : vector<8x32xf32>
    %123 = vector.broadcast %104 : vector<1x32xf32> to vector<8x32xf32>
    %124 = arith.addf %122, %123 : vector<8x32xf32>
    %c0_39 = arith.constant 0 : index
    %c0_40 = arith.constant 0 : index
    %c0_41 = arith.constant 0 : index
    %125 = vector.load %arg8[%c0_39, %c0_40, %c0_41] : memref<1x8x32xf32, #tpu.memory_space<vmem>>, vector<1x8x32xf32>
    %126 = vector.shape_cast %125 : vector<1x8x32xf32> to vector<8x32xf32>
    %127 = vector.shape_cast %124 : vector<8x32xf32> to vector<1x8x32xf32>
    tpu.vector_store %arg8[%c0_39, %c0_40, %c0_41], %127 {strides = array<i32>} : memref<1x8x32xf32, #tpu.memory_space<vmem>>, vector<1x8x32xf32>,
    return
  }
  func.func @transform_0(%arg0: i32) -> (i32, i32, i32) {
    %c0_i32 = arith.constant 0 : i32
    %c0_i32_0 = arith.constant 0 : i32
    %c0_i32_1 = arith.constant 0 : i32
    return %arg0, %c0_i32, %c0_i32_0 : i32, i32, i32
  }
  func.func @transform_1(%arg0: i32) -> (i32, i32) {
    %c0_i32 = arith.constant 0 : i32
    %c0_i32_0 = arith.constant 0 : i32
    %c0_i32_1 = arith.constant 0 : i32
    return %c0_i32, %c0_i32_0 : i32, i32
  }
  func.func @transform_2(%arg0: i32) -> (i32, i32) {
    %c0_i32 = arith.constant 0 : i32
    %c0_i32_0 = arith.constant 0 : i32
    %c0_i32_1 = arith.constant 0 : i32
    return %c0_i32, %c0_i32_0 : i32, i32
  }
  func.func @transform_3(%arg0: i32) -> (i32, i32) {
    %c0_i32 = arith.constant 0 : i32
    %c0_i32_0 = arith.constant 0 : i32
    %c0_i32_1 = arith.constant 0 : i32
    return %c0_i32, %c0_i32_0 : i32, i32
  }
  func.func @transform_4(%arg0: i32) -> (i32, i32) {
    %c0_i32 = arith.constant 0 : i32
    %c0_i32_0 = arith.constant 0 : i32
    %c0_i32_1 = arith.constant 0 : i32
    return %c0_i32, %c0_i32_0 : i32, i32
  }
  func.func @transform_5(%arg0: i32) -> (i32, i32) {
    %c0_i32 = arith.constant 0 : i32
    %c0_i32_0 = arith.constant 0 : i32
    %c0_i32_1 = arith.constant 0 : i32
    return %c0_i32, %c0_i32_0 : i32, i32
  }
  func.func @transform_6(%arg0: i32) -> (i32, i32) {
    %c0_i32 = arith.constant 0 : i32
    %c0_i32_0 = arith.constant 0 : i32
    %c0_i32_1 = arith.constant 0 : i32
    return %c0_i32, %c0_i32_0 : i32, i32
  }
  func.func @transform_7(%arg0: i32) -> (i32, i32, i32) {
    %c0_i32 = arith.constant 0 : i32
    %c0_i32_0 = arith.constant 0 : i32
    %c0_i32_1 = arith.constant 0 : i32
    return %arg0, %c0_i32, %c0_i32_0 : i32, i32, i32
  }
}

</mosaic_0001>

<bundles_post_ra>
// kernel: tpu_custom_call.1
= control target key start
LH: loop header
LB: loop body
LE: loop exit
PB: predicated region body
PF: predicated region fallthrough
CT: control target
= control target key end

     0   :  { %12 = vsyncpa [#allocation3], 0  ;;  %s1976_s0 = inlined_call_operand.hbm [shape: f32[2,8,32], index: 0, kind: input, shape index: {}]   ;;  %s1977_s1 = inlined_call_operand.hbm [shape: bf16[32,96], index: 1, kind: input, shape index: {}]   ;;  %s1978_s2 = inlined_call_operand.vmem [shape: f32[1,96], index: 2, kind: input, shape index: {}]   ;;  %s1979_s3 = inlined_call_operand.hbm [shape: bf16[32,32], index: 3, kind: input, shape index: {}]   ;;  %s1980_s4 = inlined_call_operand.vmem [shape: f32[1,32], index: 4, kind: input, shape index: {}]   ;;  %s1981_s5 = inlined_call_operand.vmem [shape: f32[1,32], index: 5, kind: input, shape index: {}]   ;;  %s1982_s6 = inlined_call_operand.vmem [shape: f32[1,32], index: 6, kind: input, shape index: {}]   ;;  %s1983_s7 = inlined_call_operand.hbm [shape: f32[2,8,32], index: 7, kind: output, shape index: {}]  }
   0x1   :  { %14 = vsyncpa [#allocation3 + $0x1], 0 }
   0x2   :  { %15 = vsyncpa [#allocation6], 0 }
   0x3   :  { %16 = vsyncpa [#allocation4], 0 }
   0x4   :  { %18 = vsyncpa [#allocation4 + $0x1], 0  ;;  %s1633_s24 = smov 0   ;;  %s1635_s25 = smov 0  }
   0x5   :  { %s1637_s26 = smov 0   ;;  %s1639_s27 = smov 0  }
   0x6 LB: > { %s1654_s28 = sadd.s32 4294967295, %s1572_s27   ;;  %s1172_s29 = sadd.s32 4294967294, %s1572_s27   ;;  %s1572_s27 = sphi %s1639_s27, %s2003_s27   ;;  %s1568_s26 = sphi %s1637_s26, %s2002_s26   ;;  %s1564_s25 = sphi %s1635_s25, %s2001_s25   ;;  %s1560_s24 = sphi %s1633_s24, %s2000_s24  }
   0x7   : > { %p44_p0 = scmp.ne.s32.totalorder %s1564_s25, %s1560_s24  ;;  %p1984_p1 = scmp.eq.s32.totalorder %s1654_s28, 0 }
   0x8   : > { %p200_p3 = scmp.eq.s32.totalorder %s1172_s29, 1  ;;  %p1173_p5 = scmp.ge.s32.totalorder %s1572_s27, 1 }
   0x9   : > { %p1663_p4 = por %p1984_p1, %p44_p0  ;;  %p207_p7 = scmp.lt.s32.totalorder %s1572_s27, 3 }
   0xa   : > { %p1668_p6 = por %p200_p3, %p44_p0  ;;  %s1574_s10 = smov [#allocation5]  }
   0xb   : > { %s1987_s30 = scalar_select %p1663_p4, 1, 0 }
   0xc   : > { %s1988_s8 = scalar_select %p1668_p6, 1, 0 }
   0xd   : > { %p1673_p8 = pnand %p1173_p5, %p207_p7  ;;  %s219_s11 = sshll.u32 %s1574_s10, 4  ;;  %s1677_s11 = int_to_ptr.vmem [resolvable:$true] %s219_s11 }
   0xe   : > { %s1575_s13 = smov [#allocation7]   ;;  %s1416_s17 = scalar_lea.hbm %s1977_s1, 256 }
   0xf   : > { %p1326_p9 = pneg %p1673_p8  ;;  %s235_s14 = sshll.u32 %s1575_s13, 4  ;;  %s1688_s14 = int_to_ptr.vmem [resolvable:$true] %s235_s14 }
  0x10   : > { %p1417_p12 = scmp.ne.s32.totalorder %s1977_s1, %s1416_s17  ;;  %p1423_p5 = scmp.lt.u32.totalorder %s1416_s17, %s1977_s1 }
  0x11   : > { %p1684_p11 = pnand %p1326_p9, %p1984_p1 }
  0x13   : > { %p1418_p13 = pneg %p1684_p11 }
  0x15   : > { %p1419_p0 = pnand %p1418_p13, %p1417_p12 }
  0x17   : > { %p1420_p3 = pneg %p1419_p0 }
  0x19   : > { %p1425_p7 = pnand %p1423_p5, %p1420_p3 }
  0x1b   : > { %1428 = shalt.err (!%p1425_p7)
}
  0x1c   : > { %s1429_s22 = scalar_lea.vmem %s1677_s11, 256  ;;  %p1437_p2 = scmp.lt.s32.totalorder %s1677_s11, %s1677_s11 }
  0x1d   : > { %p1430_p9 = scmp.ne.s32.totalorder %s1677_s11, %s1429_s22  ;;  %p1438_p12 = scmp.lt.s32.totalorder %s1429_s22, %s1429_s22 }
  0x1f   : > { %p1432_p10 = pnand %p1430_p9, %p1418_p13  ;;  %p1439_p0 = por %p1438_p12, %p1437_p2 }
  0x21   : > { %p1433_p1 = pneg %p1432_p10 }
  0x23   : > { %p1440_p6 = pnand %p1439_p0, %p1433_p1 }
  0x25   : > { %1443 = shalt.err (!%p1440_p6)
}
  0x26   : > { %s1576_s23 = smov 64   ;;  %s1577_s29 = smov 4  }
  0x27   : > { %1329 = dma.hbm_to_vmem [thread:$0]  (!%p1684_p11), %s1977_s1, 256, %s1677_s11, [#allocation6], %s1576_s23, %s1576_s23, %s1577_s29  }
  0x28   : > { %s1444_s17 = scalar_lea.hbm %s1979_s3, 256 }
  0x29   : > { %p1445_p2 = scmp.ne.s32.totalorder %s1979_s3, %s1444_s17  ;;  %p1451_p10 = scmp.lt.u32.totalorder %s1444_s17, %s1979_s3 }
  0x2b   : > { %p1447_p1 = pnand %p1445_p2, %p1418_p13 }
  0x2d   : > { %p1448_p6 = pneg %p1447_p1 }
  0x2f   : > { %p1453_p3 = pnand %p1451_p10, %p1448_p6 }
  0x31   : > { %1456 = shalt.err (!%p1453_p3)
}
  0x32   : > { %s1457_s11 = scalar_lea.vmem %s1688_s14, 256  ;;  %p1465_p12 = scmp.lt.s32.totalorder %s1688_s14, %s1688_s14 }
  0x33   : > { %p1458_p5 = scmp.ne.s32.totalorder %s1688_s14, %s1457_s11  ;;  %p1466_p0 = scmp.lt.s32.totalorder %s1457_s11, %s1457_s11 }
  0x35   : > { %p1460_p7 = pnand %p1458_p5, %p1418_p13  ;;  %p1467_p2 = por %p1466_p0, %p1465_p12 }
  0x37   : > { %p1461_p9 = pneg %p1460_p7 }
  0x39   : > { %p1468_p1 = pnand %p1467_p2, %p1461_p9 }
  0x3b   : > { %1471 = shalt.err (!%p1468_p1)
}
  0x3c   : > { %1332 = dma.hbm_to_vmem [thread:$0]  (!%p1684_p11), %s1979_s3, 256, %s1688_s14, [#allocation6], %s1576_s23, %s1576_s23, %s1577_s29  }
  0x3d   : > { %s1743_s13 = sadd.s32 1, %s1572_s27   ;;  %s31_s12 = sadd.s32 1, %s1568_s26 }
  0x3e   : > { %s28_s15 = ssub.s32 %s1572_s27, %s1743_s13  ;;  %p38_p13 = scmp.ne.s32.totalorder %s1568_s26, %s1564_s25 }
  0x3f   : > { %p29_p6 = scmp.eq.s32.totalorder %s28_s15, 0  ;;  %p39_p10 = scmp.eq.s32.totalorder %s1572_s27, 0 }
  0x40   : > { %p1991_p3 = scmp.eq.s32.totalorder %s1654_s28, 1  ;;  %p1343_p7 = scmp.lt.s32.totalorder %s1572_s27, 2 }
  0x41   : > { %s1759_s17 = scalar_select %p29_p6, %s1568_s26, %s31_s12  }
  0x42   : > { %p1753_p5 = por %p1991_p3, %p38_p13  ;;  %p40_p9 = por %p39_p10, %p38_p13 }
  0x43   : > { %s258_s18 = sand.u32 1, %s1568_s26   ;;  %s1178_s14 = sshll.u32 %s1572_s27, 7 }
  0x44   : > { %s1992_s16 = scalar_select %p1753_p5, 1, 0 }
  0x45   : > { %s1177_s19 = sshll.u32 %s258_s18, 3  ;;  %s1766_s20 = scalar_lea.hbm %s1976_s0, %s1178_s14 }
  0x46   : > { %s262_s21 = scalar_lea.vmem [#allocation2], %s1177_s19  ;;  %p1770_p11 = pnand %p1343_p7, %p40_p9 }
  0x47   : > { %s269_s11 = sshll.u32 %s262_s21, 4  ;;  %s259_s10 = scalar_lea.sflag [#allocation3], %s258_s18  ;;  %s1768_s11 = int_to_ptr.vmem [resolvable:$true] %s269_s11 }
  0x48   : > { %s1472_s12 = scalar_lea.hbm %s1766_s20, 128  ;;  %p1474_p0 = pneg %p1770_p11 }
  0x49   : > { %p1473_p12 = scmp.ne.s32.totalorder %s1766_s20, %s1472_s12  ;;  %s1477_s14 = scalar_lea.hbm %s1976_s0, 256 }
  0x4a   : > { %p1478_p13 = scmp.lt.u32.totalorder %s1766_s20, %s1976_s0  ;;  %p1479_p6 = scmp.lt.u32.totalorder %s1477_s14, %s1472_s12 }
  0x4b   : > { %p1475_p2 = pnand %p1474_p0, %p1473_p12  ;;  %p1481_p3 = scmp.lt.u32.totalorder %s1472_s12, %s1766_s20 }
  0x4c   : > { %p1480_p10 = por %p1479_p6, %p1478_p13 }
  0x4d   : > { %p1476_p1 = pneg %p1475_p2 }
  0x4e   : > { %p1482_p7 = por %p1481_p3, %p1480_p10 }
  0x50   : > { %p1483_p9 = pnand %p1482_p7, %p1476_p1 }
  0x52   : > { %1486 = shalt.err (!%p1483_p9)
}
  0x53   : > { %s1487_s18 = scalar_lea.vmem %s1768_s11, 128  ;;  %s1578_s21 = smov [#allocation2]  }
  0x54   : > { %p1488_p12 = scmp.ne.s32.totalorder %s1768_s11, %s1487_s18  ;;  %s1492_s15 = sshll.u32 %s1578_s21, 4  ;;  %s1493_s15 = int_to_ptr.vmem [resolvable:$false] %s1492_s15 }
  0x55   : > { %s1494_s19 = scalar_lea.vmem %s1493_s15, 256  ;;  %p1495_p4 = scmp.lt.s32.totalorder %s1768_s11, %s1493_s15 }
  0x56   : > { %p1490_p2 = pnand %p1488_p12, %p1474_p0  ;;  %p1496_p13 = scmp.lt.s32.totalorder %s1494_s19, %s1487_s18 }
  0x58   : > { %p1491_p5 = pneg %p1490_p2  ;;  %p1497_p6 = por %p1496_p13, %p1495_p4 }
  0x5a   : > { %p1498_p10 = pnand %p1497_p6, %p1491_p5 }
  0x5c   : > { %1501 = shalt.err (!%p1498_p10)
}
  0x5d   : > { %1336 = dma.hbm_to_vmem [thread:$0]  (!%p1770_p11), %s1766_s20, 128, %s1768_s11, %s259_s10  }
  0x5e   : > { %278 = sbr.rel (%p1673_p8) target bundleno = 3035 (0xbdb), region = 48  ;;  %s1802_s12 = sand.u32 (!%p1673_p8), 1, %s1564_s25  }
  0x5f   : > { %s1180_s14 = sshll.u32 (!%p1673_p8), %s1802_s12, 3  ;;  %s281_s23 = scalar_lea.sflag (!%p1673_p8), [#allocation3], %s1802_s12 }
  0x60   : > { %s284_s29 = scalar_lea.vmem (!%p1673_p8), [#allocation2], %s1180_s14  ;;  %p1994_p4 = scmp.ne.s32.totalorder (!%p1673_p8), %s1987_s30, 0 }
  0x65   : > { %1547 = dma.done.wait (%p1994_p4), %s281_s23, 128  }
  0x66   : > { %1549 = vsyncadd (%p1994_p4), %s281_s23, 4294967168  ;;  %p1995_p5 = scmp.eq.s32.totalorder %s1654_s28, 0 }
  0x68   : > { %1551 = dma.done.wait (%p1995_p5), [#allocation6], 512   ;;  %p1996_p8 = pmov %p1995_p5 }
  0x69   : > { %v1579_v0 = vmov 0.0   ;;  %vm1580_vm0 = vmmov 0   ;;  %v1396_v1 = vld [vmem:[#allocation5] sm:$0xff]   ;;  %v1397_v2 = vld [vmem:[#allocation5 + $0x8] sm:$0xff]   ;;  %v1822_v3 = vld [vmem:[%s284_s29] sm:$0xff]  ;;  %vm349_vm1 = vcmask 261120  }
  0x6a   : > { %1553 = vsyncadd (%p1996_p8), [#allocation6], 4294966784  ;;  %1234 = vmatprep.subr.bf16.mxu0 %v1579_v0  ;;  %1238 = vmatprep.mubr.msk.bf16.mxu0 %vm1580_vm0, %v1579_v0  ;;  %v325_v4 = vpack.c.bf16 %v1822_v3, %v1822_v3  ;;  %v1184_v5 = vld [vmem:[%s1978_s2] ss:$0 sm:$0xff]  ;;  %s1581_s20 = smov 120   ;;  %s1582_s11 = smov 96  }
  0x6b   : > { %1242 = vmatprep.subr.bf16.mxu1 %v1579_v0  ;;  %1244 = vmatprep.mubr.msk.bf16.mxu1 %vm1580_vm0, %v1579_v0  ;;  %s1583_s22 = smov 88   ;;  %vm402_vm2 = vcmask 64512   ;;  %s1584_s10 = smov 64   ;;  %vm466_vm3 = vcmask 1043456   ;;  %v393_v49 = vld [vmem:[#allocation7] sm:$0xf] }
  0x6c   : > { %1235 = vmatpush3.bf16.msra.mxu0 %v1396_v1  ;;  %s1585_s18 = smov 56   ;;  %s1586_s21 = smov 112   ;;  %v672_v50 = vsel %vm466_vm3, %v393_v49, 0  ;;  %v394_v51 = vld [vmem:[#allocation7 + $0x4] sm:$0xf] }
  0x6d   : > { %1236 = vmatprep.subr.bf16.mxu0 %v1579_v0  ;;  %s1587_s15 = smov 80   ;;  %v626_v52 = vsel %vm466_vm3, %v394_v51, 0  ;;  %s1588_s19 = smov 72   ;;  %v396_v51 = vld [vmem:[#allocation7 + $0xc] sm:$0xf] }
  0x6e   : > { %s1589_s23 = smov 104   ;;  %s1590_s29 = smov 48  }
  0x6f   : > { %s1591_s30 = smov 40   ;;  %s1070_s9 = scalar_lea.sflag [#allocation4], %s1802_s12 }
  0x70   : > { %1237 = vmatpush3.bf16.msra.mxu0 %v1397_v2  ;;  %p1997_p0 = scmp.ne.s32.totalorder %s1992_s16, 0 }
  0x71   : > { %1248 = vmatprep.subr.bf16.mxu0 %v1579_v0 }
  0x73   : > { %1239 = vmatmul.mubr.msk.bf16.vlgmr.msra.gmra.mrb[0].mxu0 %vm349_vm1, %v325_v4 }
  0x74   : > { %1250 = vmatprep.mubr.msk.bf16.mxu0 %vm1580_vm0, %v1579_v0 }
 0x146   : > { %v387_v6 = vpop.f32.mrb[0].mxu0 }
 0x147   : > { %v388_v7 = vadd.f32 %v1184_v5, %v387_v6  ;;  %v1240_v8 = vpop.f32.mrb[1].mxu0 }
 0x148   : > { %v390_v9 = vpop.f32.mrb[2].mxu0 }
 0x149   : > { %v1834_v10 = vpack.c.bf16 %v388_v7, %v388_v7  ;;  %v1241_v11 = vpop.f32.mrb[3].mxu0 }
 0x14b   : > { %511 = vrot.lane.b32.xlu1 %v1834_v10, %s1581_s20  ;;  %400 = vrot.lane.b32.xlu0 %v1834_v10, %s1582_s11 }
 0x14f   : > { %513 = vrot.lane.b32.xlu0 %v1834_v10, %s1583_s22 }
 0x1bd   : > { %v401_v12 = vpop.permute.xlu0 %400  ;;  %v512_v16 = vpop.permute.xlu1 %511 }
 0x1be   : > { %v407_v13 = vsel %vm402_vm2, %v401_v12, 0 }
 0x1bf   : > { %1243 = vmatpush3.bf16.xpose.msra.mxu1 %v407_v13 }
 0x1c0   : > { %1254 = vmatprep.subr.bf16.mxu1 %v1579_v0 }
 0x1c1   : > { %v514_v14 = vpop.permute.xlu0 %513 }
 0x1c2   : > { %v519_v15 = vsel %vm402_vm2, %v514_v14, 0 }
 0x1c6   : > { %1245 = vmatmul.mubr.msk.bf16.vlgmr.msra.gmra.mrb[0].mxu1 %vm402_vm2, %v1834_v10 }
 0x1c7   : > { %1255 = vmatpush3.bf16.xpose.msra.mxu1 %v519_v15  ;;  %1256 = vmatprep.mubr.msk.bf16.mxu1 %vm1580_vm0, %v1579_v0 }
 0x1c8   : > { %1266 = vmatprep.subr.bf16.mxu1 %v1579_v0 }
 0x1ce   : > { %1257 = vmatmul.mubr.msk.bf16.vlgmr.msra.gmra.mrb[4].mxu1 %vm402_vm2, %v512_v16 }
 0x1cf   : > { %1268 = vmatprep.mubr.msk.bf16.mxu1 %vm1580_vm0, %v1579_v0  ;;  %1267 = vmatpush3.bf16.msra.mxu1 %v626_v52  ;;  %v987_v52 = vsel %vm466_vm3, %v396_v51, 0 }
 0x1d0   : > { %1278 = vmatprep.subr.bf16.mxu1 %v1579_v0 }
 0x299   : > { %v443_v17 = vpop.f32.mrb[0].mxu1 }
 0x29a   : > { %v1246_v18 = vpop.f32.mrb[1].mxu1  ;;  %v449_v19 = vsel %vm402_vm2, %v443_v17, -inf }
 0x29b   : > { %450 = vmax.xlane.f32.xlu1 %v449_v19  ;;  %v446_v20 = vpop.f32.mrb[2].mxu1 }
 0x29c   : > { %v1247_v21 = vpop.f32.mrb[3].mxu1 }
 0x2a1   : > { %v555_v22 = vpop.f32.mrb[4].mxu1 }
 0x2a2   : > { %v1258_v23 = vpop.f32.mrb[5].mxu1  ;;  %v561_v24 = vsel %vm402_vm2, %v555_v22, -inf }
 0x2a3   : > { %562 = vmax.xlane.f32.xlu0 %v561_v24  ;;  %v558_v25 = vpop.f32.mrb[6].mxu1 }
 0x2a4   : > { %v1259_v26 = vpop.f32.mrb[7].mxu1 }
 0x328   : > { %v451_v27 = vpop.xlane.xlu1 %450 }
 0x329   : > { %v452_v28 = vsub.f32 %v443_v17, %v451_v27 }
 0x32b   : > { %v453_v29 = vmul.f32 1.442695, %v452_v28 }
 0x32d   : > { %1398 = vpow2.f32 %v453_v29 }
 0x330   : > { %v563_v30 = vpop.xlane.xlu0 %562 }
 0x331   : > { %v564_v31 = vsub.f32 %v555_v22, %v563_v30 }
 0x333   : > { %v565_v32 = vmul.f32 1.442695, %v564_v31 }
 0x335   : > { %1400 = vpow2.f32 %v565_v32 }
 0x337   : > { %v1399_v33 = vpop.eup %1398 }
 0x338   : > { %v455_v34 = vsel %vm402_vm2, %v1399_v33, 0.0 }
 0x339   : > { %456 = vadd.xlane.f32.xlu0 %v455_v34 }
 0x33f   : > { %v1401_v35 = vpop.eup %1400 }
 0x340   : > { %v567_v36 = vsel %vm402_vm2, %v1401_v35, 0.0 }
 0x341   : > { %568 = vadd.xlane.f32.xlu1 %v567_v36 }
 0x34f   : > { %461 = vrot.lane.b32.xlu0 %v1834_v10, %s1584_s10 }
 0x352   : > { %573 = vrot.lane.b32.xlu1 %v1834_v10, %s1585_s18 }
 0x353   : > { %714 = vrot.lane.b32.xlu0 %v1834_v10, %s1586_s21  ;;  %s1204_s21 = sshll.u32 %s1654_s28, 7  ;;  %s1592_s28 = smov [#allocation8]  }
 0x356   : > { %716 = vrot.lane.b32.xlu1 %v1834_v10, %s1587_s15  ;;  %s322_s15 = scalar_lea.vmem [#allocation8], %s1180_s14  ;;  %s1506_s14 = sshll.u32 %s1592_s28, 4  ;;  %s1507_s14 = int_to_ptr.vmem [resolvable:$false] %s1506_s14 }
 0x357   : > { %s1508_s11 = scalar_lea.vmem %s1507_s14, 256 }
 0x3c6   : > { %v457_v37 = vpop.xlane.xlu0 %456 }
 0x3c7   : > { %1402 = vrcp.f32 %v457_v37 }
 0x3ca   : > { %v462_v38 = vpop.permute.xlu0 %461 }
 0x3cb   : > { %v468_v39 = vsel %vm466_vm3, %v462_v38, 0 }
 0x3cc   : > { %1249 = vmatpush3.bf16.msra.mxu0 %v468_v39 }
 0x3cd   : > { %1260 = vmatprep.subr.bf16.mxu0 %v1579_v0 }
 0x3ce   : > { %v569_v40 = vpop.xlane.xlu1 %568  ;;  %v715_v2 = vpop.permute.xlu0 %714 }
 0x3cf   : > { %1404 = vrcp.f32 %v569_v40 }
 0x3d1   : > { %v1403_v41 = vpop.eup %1402 }
 0x3d2   : > { %v459_v42 = vmul.f32 %v1403_v41, %v1399_v33  ;;  %v574_v43 = vpop.permute.xlu1 %573  ;;  %v395_v33 = vld [vmem:[#allocation7 + $0x8] sm:$0xf] }
 0x3d3   : > { %v579_v45 = vsel %vm466_vm3, %v574_v43, 0  ;;  %v829_v34 = vsel %vm466_vm3, %v395_v33, 0 }
 0x3d4   : > { %v460_v44 = vpack.c.bf16 %v459_v42, %v459_v42 }
 0x3d6   : > { %1251 = vmatmul.mubr.msk.bf16.vlgmr.msra.gmra.mrb[4].mxu0 %vm402_vm2, %v460_v44  ;;  %v717_v58 = vpop.permute.xlu1 %716 }
 0x3d7   : > { %1261 = vmatpush3.bf16.msra.mxu0 %v579_v45  ;;  %1262 = vmatprep.mubr.msk.bf16.mxu0 %vm1580_vm0, %v1579_v0  ;;  %v722_v63 = vsel %vm402_vm2, %v717_v58, 0 }
 0x3d8   : > { %1272 = vmatprep.subr.bf16.mxu0 %v1579_v0 }
 0x3d9   : > { %v1405_v46 = vpop.eup %1404 }
 0x3da   : > { %v571_v47 = vmul.f32 %v1405_v46, %v1401_v35 }
 0x3dc   : > { %v572_v48 = vpack.c.bf16 %v571_v47, %v571_v47 }
 0x3de   : > { %1263 = vmatmul.mubr.msk.bf16.vlgmr.msra.gmra.mrb[8].mxu0 %vm402_vm2, %v572_v48 }
 0x3df   : > { %1274 = vmatprep.mubr.msk.bf16.mxu0 %vm1580_vm0, %v1579_v0  ;;  %1273 = vmatpush3.bf16.msra.mxu0 %v672_v50 }
 0x3e0   : > { %1284 = vmatprep.subr.bf16.mxu0 %v1579_v0 }
 0x4a9   : > { %v504_v53 = vpop.f32.mrb[4].mxu0 }
 0x4aa   : > { %v510_v54 = vpack.c.bf16 %v504_v53, %v504_v53  ;;  %v1252_v55 = vpop.f32.mrb[5].mxu0 }
 0x4ab   : > { %v507_v56 = vpop.f32.mrb[6].mxu0 }
 0x4ac   : > { %v1253_v57 = vpop.f32.mrb[7].mxu0  ;;  %1275 = vmatmul.mubr.msk.bf16.vlgmr.msra.gmra.mrb[12].mxu0 %vm402_vm2, %v510_v54 }
 0x4ad   : > { %1286 = vmatprep.mubr.msk.bf16.mxu0 %vm1580_vm0, %v1579_v0 }
 0x4b1   : > { %v615_v59 = vpop.f32.mrb[8].mxu0 }
 0x4b2   : > { %v621_v60 = vpack.c.bf16 %v615_v59, %v615_v59  ;;  %v1264_v61 = vpop.f32.mrb[9].mxu0 }
 0x4b3   : > { %v618_v62 = vpop.f32.mrb[10].mxu0 }
 0x4b4   : > { %v1265_v1 = vpop.f32.mrb[11].mxu0  ;;  %1269 = vmatmul.mubr.msk.bf16.vlgmr.msra.gmra.mrb[8].mxu1 %vm402_vm2, %v621_v60 }
 0x4b5   : > { %1279 = vmatpush3.bf16.xpose.msra.mxu1 %v722_v63  ;;  %1280 = vmatprep.mubr.msk.bf16.mxu1 %vm1580_vm0, %v1579_v0 }
 0x4b6   : > { %1290 = vmatprep.subr.bf16.mxu1 %v1579_v0 }
 0x4bc   : > { %1281 = vmatmul.mubr.msk.bf16.vlgmr.msra.gmra.mrb[12].mxu1 %vm402_vm2, %v715_v2 }
 0x4bd   : > { %1292 = vmatprep.mubr.msk.bf16.mxu1 %vm1580_vm0, %v1579_v0  ;;  %1291 = vmatpush3.bf16.msra.mxu1 %v829_v34 }
 0x4be   : > { %1302 = vmatprep.subr.bf16.mxu1 %v1579_v0 }
 0x57f   : > { %v708_v4 = vpop.f32.mrb[12].mxu0 }
 0x580   : > { %v1276_v5 = vpop.f32.mrb[13].mxu0 }
 0x581   : > { %v711_v6 = vpop.f32.mrb[14].mxu0 }
 0x582   : > { %v1277_v7 = vpop.f32.mrb[15].mxu0 }
 0x587   : > { %v662_v8 = vpop.f32.mrb[8].mxu1 }
 0x588   : > { %v1883_v9 = vadd.f32 %v708_v4, %v662_v8  ;;  %v1270_v11 = vpop.f32.mrb[9].mxu1  ;;  %v1200_v4 = vld [vmem:[%s1980_s4] ss:$0 sm:$0xff] }
 0x589   : > { %v665_v12 = vpop.f32.mrb[10].mxu1 }
 0x58a   : > { %v1271_v13 = vpop.f32.mrb[11].mxu1 }
 0x58f   : > { %v758_v14 = vpop.f32.mrb[12].mxu1 }
 0x590   : > { %v1282_v15 = vpop.f32.mrb[13].mxu1  ;;  %v764_v16 = vsel %vm402_vm2, %v758_v14, -inf }
 0x591   : > { %765 = vmax.xlane.f32.xlu1 %v764_v16  ;;  %v761_v17 = vpop.f32.mrb[14].mxu1 }
 0x592   : > { %v1283_v18 = vpop.f32.mrb[15].mxu1 }
 0x5a2   : > { %874 = vrot.lane.b32.xlu1 %v1834_v10, %s1588_s19  ;;  %s1083_s19 = sshll.u32 %s322_s15, 4  ;;  %s1933_s19 = int_to_ptr.vmem [resolvable:$true] %s1083_s19 }
 0x5a3   : > { %s1502_s20 = scalar_lea.vmem %s1933_s19, 128  ;;  %p1509_p7 = scmp.lt.s32.totalorder %s1933_s19, %s1507_s14 }
 0x5a4   : > { %p1503_p11 = scmp.ne.s32.totalorder %s1933_s19, %s1502_s20  ;;  %p1510_p9 = scmp.lt.s32.totalorder %s1508_s11, %s1502_s20 }
 0x5a6   : > { %872 = vrot.lane.b32.xlu1 %v1834_v10, %s1589_s23  ;;  %p1504_p1 = pnand %p1503_p11, %p1997_p0  ;;  %p1511_p12 = por %p1510_p9, %p1509_p7 }
 0x5a8   : > { %p1505_p3 = pneg %p1504_p1 }
 0x5aa   : > { %p1512_p2 = pnand %p1511_p12, %p1505_p3 }
 0x61e   : > { %v766_v19 = vpop.xlane.xlu1 %765 }
 0x61f   : > { %v767_v20 = vsub.f32 %v758_v14, %v766_v19 }
 0x621   : > { %v768_v21 = vmul.f32 1.442695, %v767_v20 }
 0x622   : > { %v875_v29 = vpop.permute.xlu1 %874 }
 0x623   : > { %1406 = vpow2.f32 %v768_v21  ;;  %v880_v31 = vsel %vm402_vm2, %v875_v29, 0 }
 0x626   : > { %v873_v32 = vpop.permute.xlu1 %872 }
 0x62d   : > { %v1407_v22 = vpop.eup %1406 }
 0x62e   : > { %v770_v23 = vsel %vm402_vm2, %v1407_v22, 0.0 }
 0x62f   : > { %771 = vadd.xlane.f32.xlu0 %v770_v23 }
 0x645   : > { %776 = vrot.lane.b32.xlu0 %v1834_v10, %s1590_s29 }
 0x6bc   : > { %v772_v24 = vpop.xlane.xlu0 %771 }
 0x6bd   : > { %1408 = vrcp.f32 %v772_v24  ;;  %v1202_v24 = vld [vmem:[%s1982_s6] ss:$0 sm:$0xff] }
 0x6c0   : > { %v777_v25 = vpop.permute.xlu0 %776 }
 0x6c1   : > { %v782_v26 = vsel %vm466_vm3, %v777_v25, 0 }
 0x6c2   : > { %1285 = vmatpush3.bf16.msra.mxu0 %v782_v26 }
 0x6c3   : > { %1296 = vmatprep.subr.bf16.mxu0 %v1579_v0 }
 0x6c7   : > { %v1409_v27 = vpop.eup %1408 }
 0x6c8   : > { %v774_v28 = vmul.f32 %v1409_v27, %v1407_v22 }
 0x6ca   : > { %v775_v30 = vpack.c.bf16 %v774_v28, %v774_v28 }
 0x6cc   : > { %1287 = vmatmul.mubr.msk.bf16.vlgmr.msra.gmra.mrb[16].mxu0 %vm402_vm2, %v775_v30 }
 0x6cd   : > { %1297 = vmatpush3.bf16.xpose.msra.mxu0 %v880_v31  ;;  %1298 = vmatprep.mubr.msk.bf16.mxu0 %vm1580_vm0, %v1579_v0 }
 0x6ce   : > { %1308 = vmatprep.subr.bf16.mxu0 %v1579_v0 }
 0x6d4   : > { %1299 = vmatmul.mubr.msk.bf16.vlgmr.msra.gmra.mrb[20].mxu0 %vm402_vm2, %v873_v32 }
 0x6d5   : > { %1310 = vmatprep.mubr.msk.bf16.mxu0 %vm1580_vm0, %v1579_v0  ;;  %1309 = vmatpush3.bf16.msra.mxu0 %v987_v52 }
 0x79f   : > { %v818_v35 = vpop.f32.mrb[16].mxu0 }
 0x7a0   : > { %v824_v36 = vpack.c.bf16 %v818_v35, %v818_v35  ;;  %v1288_v37 = vpop.f32.mrb[17].mxu0 }
 0x7a1   : > { %v821_v38 = vpop.f32.mrb[18].mxu0 }
 0x7a2   : > { %v1289_v39 = vpop.f32.mrb[19].mxu0  ;;  %1293 = vmatmul.mubr.msk.bf16.vlgmr.msra.gmra.mrb[16].mxu1 %vm402_vm2, %v824_v36 }
 0x7a3   : > { %1304 = vmatprep.mubr.msk.bf16.mxu1 %vm1580_vm0, %v1579_v0 }
 0x7a7   : > { %v916_v40 = vpop.f32.mrb[20].mxu0 }
 0x7a8   : > { %v1300_v41 = vpop.f32.mrb[21].mxu0  ;;  %v922_v42 = vsel %vm402_vm2, %v916_v40, -inf }
 0x7a9   : > { %923 = vmax.xlane.f32.xlu0 %v922_v42  ;;  %v919_v43 = vpop.f32.mrb[22].mxu0 }
 0x7aa   : > { %v1301_v44 = vpop.f32.mrb[23].mxu0 }
 0x7bf   : > { %934 = vrot.lane.b32.xlu0 %v1834_v10, %s1591_s30  ;;  %s1931_s30 = scalar_lea.hbm %s1983_s7, %s1204_s21 }
 0x836   : > { %v924_v45 = vpop.xlane.xlu0 %923 }
 0x837   : > { %v925_v46 = vsub.f32 %v916_v40, %v924_v45 }
 0x839   : > { %v926_v47 = vmul.f32 1.442695, %v925_v46 }
 0x83a   : > { %v935_v48 = vpop.permute.xlu0 %934 }
 0x83b   : > { %1410 = vpow2.f32 %v926_v47  ;;  %v940_v49 = vsel %vm466_vm3, %v935_v48, 0 }
 0x83c   : > { %1303 = vmatpush3.bf16.msra.mxu1 %v940_v49 }
 0x845   : > { %v1411_v50 = vpop.eup %1410 }
 0x846   : > { %v928_v0 = vsel %vm402_vm2, %v1411_v50, 0.0 }
 0x847   : > { %929 = vadd.xlane.f32.xlu1 %v928_v0 }
 0x875   : > { %v865_v53 = vpop.f32.mrb[16].mxu1 }
 0x876   : > { %v871_v54 = vadd.f32 %v865_v53, %v1883_v9  ;;  %v1294_v10 = vpop.f32.mrb[17].mxu1 }
 0x877   : > { %v868_v55 = vpop.f32.mrb[18].mxu1 }
 0x878   : > { %v1295_v56 = vpop.f32.mrb[19].mxu1 }
 0x8d4   : > { %v930_v57 = vpop.xlane.xlu1 %929 }
 0x8d5   : > { %1412 = vrcp.f32 %v930_v57 }
 0x8df   : > { %v1413_v58 = vpop.eup %1412 }
 0x8e0   : > { %v932_v59 = vmul.f32 %v1413_v58, %v1411_v50 }
 0x8e2   : > { %v933_v60 = vpack.c.bf16 %v932_v59, %v932_v59 }
 0x8e4   : > { %1305 = vmatmul.mubr.msk.bf16.vlgmr.msra.gmra.mrb[20].mxu1 %vm402_vm2, %v933_v60 }
 0x9b7   : > { %v976_v61 = vpop.f32.mrb[20].mxu1 }
 0x9b8   : > { %v982_v62 = vpack.c.bf16 %v976_v61, %v976_v61  ;;  %v1306_v63 = vpop.f32.mrb[21].mxu1 }
 0x9b9   : > { %v979_v1 = vpop.f32.mrb[22].mxu1 }
 0x9ba   : > { %v1307_v2 = vpop.f32.mrb[23].mxu1  ;;  %1311 = vmatmul.mubr.msk.bf16.vlgmr.msra.gmra.mrb[24].mxu0 %vm402_vm2, %v982_v62 }
 0xa8d   : > { %v1023_v5 = vpop.f32.mrb[24].mxu0 }
 0xa8e   : > { %v1029_v6 = vadd.f32 %v1023_v5, %v871_v54  ;;  %v1312_v7 = vpop.f32.mrb[25].mxu0 }
 0xa8f   : > { %v1026_v8 = vpop.f32.mrb[26].mxu0 }
 0xa90   : > { %v1036_v9 = vadd.f32 %v1200_v4, %v1029_v6  ;;  %v1313_v11 = vpop.f32.mrb[27].mxu0 }
 0xa92   : > { %v1037_v12 = vadd.f32 %v1036_v9, %v1822_v3  ;;  %v1201_v3 = vld [vmem:[%s1981_s5] ss:$0 sm:$0xff] }
 0xa94   : > { %v1040_v13 = vsel %vm349_vm1, %v1037_v12, 0.0 }
 0xa95   : > { %1041 = vadd.xlane.f32.xlu1 %v1040_v13 }
 0xb22   : > { %v1042_v14 = vpop.xlane.xlu1 %1041 }
 0xb23   : > { %v1044_v15 = vmul.f32 0.03125, %v1042_v14 }
 0xb25   : > { %v1045_v16 = vsub.f32 %v1037_v12, %v1044_v15 }
 0xb27   : > { %v1046_v17 = vmul.f32 %v1045_v16, %v1045_v16 }
 0xb29   : > { %v1047_v18 = vsel %vm349_vm1, %v1046_v17, 0.0 }
 0xb2a   : > { %1048 = vadd.xlane.f32.xlu1 %v1047_v18 }
 0xbb7   : > { %v1049_v19 = vpop.xlane.xlu1 %1048 }
 0xbb8   : > { %v1050_v20 = vmul.f32 0.03125, %v1049_v19 }
 0xbba   : > { %v1051_v21 = vadd.f32 1e-05, %v1050_v20 }
 0xbbc   : > { %1414 = vrsqrt.f32 %v1051_v21 }
 0xbc6   : > { %v1415_v22 = vpop.eup %1414 }
 0xbc7   : > { %v1053_v23 = vmul.f32 %v1415_v22, %v1045_v16 }
 0xbc9   : > { %v1060_v25 = vmul.f32 %v1201_v3, %v1053_v23 }
 0xbcb   : > { %v1067_v26 = vadd.f32 %v1202_v24, %v1060_v25 }
 0xbcd   : > { %1068 = vst.msk [vmem:[%s322_s15] sm:$0xff] %vm349_vm1, %v1067_v26 }
 0xbce   : > { %1515 = shalt.err (!%p1512_p2)
}
 0xbcf   : > { %s1516_s12 = scalar_lea.hbm %s1931_s30, 128  ;;  %s1520_s18 = scalar_lea.hbm %s1983_s7, 256 }
 0xbd0   : > { %p1517_p13 = scmp.ne.s32.totalorder %s1931_s30, %s1516_s12  ;;  %p1521_p4 = scmp.lt.u32.totalorder %s1931_s30, %s1983_s7 }
 0xbd1   : > { %p1522_p5 = scmp.lt.u32.totalorder %s1520_s18, %s1516_s12  ;;  %p1524_p11 = scmp.lt.u32.totalorder %s1516_s12, %s1931_s30 }
 0xbd2   : > { %p1518_p6 = pnand %p1517_p13, %p1997_p0 }
 0xbd3   : > { %p1523_p8 = por %p1522_p5, %p1521_p4 }
 0xbd4   : > { %p1519_p10 = pneg %p1518_p6 }
 0xbd5   : > { %p1525_p1 = por %p1524_p11, %p1523_p8 }
 0xbd7   : > { %p1526_p3 = pnand %p1525_p1, %p1519_p10 }
 0xbd9   : > { %1529 = shalt.err (!%p1526_p3)
}
 0xbda   : > { %1324 = dma.vmem_to_hbm [thread:$0]  (%p1997_p0), %s1933_s19, 128, %s1931_s30, %s1070_s9  }
 0xbdb PF: > { %s1095_s23 = sand.u32 1, %s1560_s24   ;;  %p1998_p7 = scmp.ne.s32.totalorder %s1988_s8, 0 }
 0xbdc   : > { %p1999_p9 = scmp.ge.s32.totalorder %s1572_s27, 2  ;;  %s1096_s29 = scalar_lea.sflag [#allocation4], %s1095_s23 }
 0xbde   : > { %p1338_p12 = pnand %p1999_p9, %p1998_p7 }
 0xbe0   : > { %1555 = dma.done.wait (!%p1338_p12), %s1096_s29, 128  }
 0xbe1   : > { %1557 = vsyncadd (!%p1338_p12), %s1096_s29, 4294967168  ;;  %p21_p2 = scmp.ge.s32.totalorder %s1743_s13, 4   ;;  %s2000_s24 = smov %s1564_s25 }
 0xbe2   : > { %s2001_s25 = smov %s1568_s26  ;;  %s2002_s26 = smov %s1759_s17 }
 0xbe3   : > { %s2003_s27 = smov %s1743_s13  ;;  %23 = sbr.rel (!%p21_p2) target bundleno = 6 (0x6), region = 101 }
 0xbea   :  { %1101 = vsyncpa [#allocation3], 1 }
 0xbeb   :  { %1103 = vsyncpa [#allocation3 + $0x1], 1 }
 0xbec   :  { %1104 = vsyncpa [#allocation6], 1 }
 0xbed   :  { %1105 = vsyncpa [#allocation4], 1 }
 0xbee   :  { %1107 = vsyncpa [#allocation4 + $0x1], 1 }

</bundles_post_ra>
